<compile_context>
chip_gen: v6e
topology: v6e:2x2x1
jax: 0.10.0
libtpu: 0.0.40
codegen_flags: <defaults>
</compile_context>

<pallas_src>
import jax
import jax.numpy as jnp
import numpy as np
from jax.experimental import pallas as pl
from jax.experimental.pallas import tpu as pltpu

BLOCK = 32  # pytorch_block_sparse uses 32x32 sparsity blocks

# Tags for the compacted sparse reduction axis (read from SMEM each step).
_TAG_ACCUM = 0   # continuation tile of a column: o += x @ w
_TAG_FIRST = 1   # first nonzero tile of a column: o  = x @ w + b
_TAG_EMPTY = 2   # column has no nonzero tiles:    o  = b


# ---------------------------------------------------------------------------
# Kernels
# ---------------------------------------------------------------------------

def _dense_kernel(x_ref, wt_ref, b_ref, o_ref):
    """Dense masked matmul: grid (M/tm, N/tn, K/tk), output-stationary over k.

    bf16 x bf16 operands -> fast single-pass MXU; f32 accumulation directly in
    the VMEM-resident f32 output tile (no scratch, no final copy).
    """
    k = pl.program_id(2)
    prod = jnp.dot(x_ref[...], wt_ref[...], preferred_element_type=jnp.float32)

    @pl.when(k == 0)
    def _():
        o_ref[...] = prod + b_ref[...]

    @pl.when(k > 0)
    def _():
        o_ref[...] += prod


def _sparse_kernel(jcol_ref, kidx_ref, tag_ref, x_ref, wt_ref, b_ref, o_ref):
    """Compacted sparse reduction: grid (M/tm, T), T = sum_j max(1, nnz[j]).

    jcol/kidx scalar-prefetch tables drive data-dependent DMA via the
    index_maps, so all-zero weight tiles are never fetched from HBM; tag
    selects init / accumulate / bias-only.  No padded dead steps.  Output
    writeback happens automatically when jcol (the output block index) changes.
    """
    del jcol_ref, kidx_ref  # consumed by the index_maps only
    t = pl.program_id(1)
    tag = tag_ref[t]

    @pl.when(tag == _TAG_FIRST)
    def _():
        o_ref[...] = jnp.dot(x_ref[...], wt_ref[...],
                             preferred_element_type=jnp.float32) + b_ref[...]

    @pl.when(tag == _TAG_ACCUM)
    def _():
        o_ref[...] += jnp.dot(x_ref[...], wt_ref[...],
                              preferred_element_type=jnp.float32)

    @pl.when(tag == _TAG_EMPTY)
    def _():
        o_ref[...] = jnp.zeros(o_ref.shape, o_ref.dtype) + b_ref[...]


# ---------------------------------------------------------------------------
# One-time parameter preprocessing (hoisted out of the forward path)
# ---------------------------------------------------------------------------

def _pick_tile(dim, preferred):
    """Largest multiple-of-128 tile <= preferred that divides dim, else dim."""
    if preferred >= dim:
        return dim
    t = (min(preferred, dim) // 128) * 128
    while t >= 128:
        if dim % t == 0:
            return t
        t -= 128
    return dim


def prepare_blocksparse_params(weight, bias, block_mask, *, tk=None, tn=None,
                               weight_dtype=jnp.bfloat16,
                               sparse_density_cutoff=0.10,
                               sparse_skip_threshold=0.90):
    """One-time preprocessing.

    weight:     (N, K) float32   (out_features, in_features)
    bias:       (N,)   float32
    block_mask: (N//32, K//32) bool

    Policy (per perf review):
      * Big MXU-friendly tiles by default (512-ish) on every TPU generation.
      * DMA-skip machinery only pays off when weight tiles can actually be
        all-zero, i.e. at low density; above ~10% density emit the plain dense
        masked matmul (no scalar prefetch, no branches).
      * Weights stored bf16 (pre-masked, transposed) for the fast MXU path and
        half the weight HBM traffic.  Pass weight_dtype=jnp.float32 for exact
        f32 parity with the PyTorch module.
        (v5e/v6e only: int8 weights + per-tile scales would halve traffic
         again; not done here since v7x's MXU has no int path.)
    """
    N, K = weight.shape
    assert N % BLOCK == 0 and K % BLOCK == 0
    assert block_mask.shape == (N // BLOCK, K // BLOCK)
    mask_np = np.asarray(block_mask, dtype=bool)
    density = float(mask_np.mean())

    sparse_regime = density <= sparse_density_cutoff
    if tk is None:
        tk = _pick_tile(K, 128 if sparse_regime else 512)
    if tn is None:
        tn = _pick_tile(N, 256 if sparse_regime else 512)
    assert tk % BLOCK == 0 and tn % BLOCK == 0

    # Masked, transposed, cast weight -> (K, N).  Done ONCE at setup.
    dense_mask = np.repeat(np.repeat(mask_np, BLOCK, axis=0), BLOCK, axis=1)
    wt = (weight * jnp.asarray(dense_mask, weight.dtype)).T.astype(weight_dtype)
    b2 = bias.reshape(1, N).astype(jnp.float32)

    # Which (K-tile, N-tile) weight tiles contain at least one kept block.
    tile_nz = (mask_np.T
               .reshape(K // tk, tk // BLOCK, N // tn, tn // BLOCK)
               .any(axis=(1, 3)))                       # (K//tk, N//tn)
    n_kt, n_nt = tile_nz.shape
    nnz_total = int(tile_nz.sum())
    use_sparse = nnz_total <= sparse_skip_threshold * n_kt * n_nt

    params = dict(wt=wt, bias=b2, N=N, K=K, tk=tk, tn=tn, use_sparse=use_sparse)

    if use_sparse:
        # Compacted per-column entry list: one entry per nonzero K-tile, plus a
        # single bias-only entry for an empty column (so its output is written).
        jcol, kidx, tags = [], [], []
        for j in range(n_nt):
            ks = np.flatnonzero(tile_nz[:, j])
            if len(ks) == 0:
                jcol.append(j); kidx.append(0); tags.append(_TAG_EMPTY)
            else:
                for pos, kt in enumerate(ks):
                    jcol.append(j)
                    kidx.append(int(kt))
                    tags.append(_TAG_FIRST if pos == 0 else _TAG_ACCUM)
        params.update(
            jcol=jnp.asarray(np.asarray(jcol, np.int32)),
            kidx=jnp.asarray(np.asarray(kidx, np.int32)),
            tags=jnp.asarray(np.asarray(tags, np.int32)),
            n_entries=len(tags))
    return params


# ---------------------------------------------------------------------------
# Forward
# ---------------------------------------------------------------------------

def blocksparse_linear(params, x, *, tm_max=512):
    """y = x @ (W ⊙ block_mask)^T + b via a Pallas TPU kernel.

    tm_max: batch-tile cap.  512 keeps the working set at a few MiB (well under
    v7x's 64 MiB VMEM) while amortizing weight re-DMA across the batch; can be
    raised to 1024 for very large batches.  On v7x keep at least one 'parallel'
    grid axis (M//tm or N//tn) >= 2 so both TensorCores are fed.
    """
    M, K = x.shape
    assert K == params["K"]
    N, tk, tn = params["N"], params["tk"], params["tn"]

    tm = M if M <= tm_max else tm_max
    # TODO(synk): cdiv + masked tail handling for batches not divisible by tm.
    assert M % tm == 0

    wt = params["wt"]
    bias = params["bias"]
    # Cast activations once in the wrapper: bf16 x bf16 -> f32 hits the fast
    # single-pass MXU path and halves activation HBM traffic.
    xq = x.astype(wt.dtype)
    out_dtype = jnp.float32  # module semantics; f32 accumulation in-place in o_ref

    est_vmem = 2 * (tm * tk * xq.dtype.itemsize + tk * tn * wt.dtype.itemsize
                    + tn * 4 + tm * tn * 4)
    vmem_limit = int(min(56 * 2**20, max(32 * 2**20, 2 * est_vmem)))

    if not params["use_sparse"]:
        # Dense masked matmul — no scalar prefetch, no per-step branches.
        # (If v5e profiling shows exposed weight-DMA latency at tiny batch, add
        #  pipeline_mode=pl.Buffered(3) on the weight BlockSpec.)
        return pl.pallas_call(
            _dense_kernel,
            out_shape=jax.ShapeDtypeStruct((M, N), out_dtype),
            grid_spec=pltpu.PrefetchScalarGridSpec(
                num_scalar_prefetch=0,
                grid=(M // tm, N // tn, K // tk),
                in_specs=[
                    pl.BlockSpec((tm, tk), lambda i, j, k: (i, k)),
                    pl.BlockSpec((tk, tn), lambda i, j, k: (k, j)),
                    pl.BlockSpec((1, tn), lambda i, j, k: (0, j)),
                ],
                out_specs=pl.BlockSpec((tm, tn), lambda i, j, k: (i, j)),
            ),
            compiler_params=pltpu.CompilerParams(
                dimension_semantics=("parallel", "parallel", "arbitrary"),
                vmem_limit_bytes=vmem_limit),
        )(xq, wt, bias)

    # Sparse path: compacted reduction axis, data-dependent DMA.
    T = params["n_entries"]
    x_map = lambda i, t, jcol, kidx, tags: (i, kidx[t])
    wt_map = lambda i, t, jcol, kidx, tags: (kidx[t], jcol[t])
    b_map = lambda i, t, jcol, kidx, tags: (0, jcol[t])
    o_map = lambda i, t, jcol, kidx, tags: (i, jcol[t])
    return pl.pallas_call(
        _sparse_kernel,
        out_shape=jax.ShapeDtypeStruct((M, N), out_dtype),
        grid_spec=pltpu.PrefetchScalarGridSpec(
            num_scalar_prefetch=3,
            grid=(M // tm, T),
            in_specs=[
                pl.BlockSpec((tm, tk), x_map),
                pl.BlockSpec((tk, tn), wt_map),
                pl.BlockSpec((1, tn), b_map),
            ],
            out_specs=pl.BlockSpec((tm, tn), o_map),
        ),
        compiler_params=pltpu.CompilerParams(
            dimension_semantics=("parallel", "arbitrary"),
            vmem_limit_bytes=vmem_limit),
    )(params["jcol"], params["kidx"], params["tags"], xq, wt, bias)


# ---------------------------------------------------------------------------
# Parameter init mirroring BlockSparseLinear's shapes / random block mask
# ---------------------------------------------------------------------------

def init_params(key, in_features, out_features, density):
    assert in_features % BLOCK == 0 and out_features % BLOCK == 0
    kw, kb, km = jax.random.split(key, 3)
    n_blk_rows = out_features // BLOCK
    n_blk_cols = in_features // BLOCK
    n_blocks = n_blk_rows * n_blk_cols
    n_keep = int(round(density * n_blocks))
    perm = jax.random.permutation(km, n_blocks)
    keep_flat = jnp.zeros((n_blocks,), dtype=bool).at[perm[:n_keep]].set(True)
    block_mask = keep_flat.reshape(n_blk_rows, n_blk_cols)
    scale = 1.0 / np.sqrt(in_features)
    weight = jax.random.normal(kw, (out_features, in_features), jnp.float32) * scale
    bias = jax.random.uniform(kb, (out_features,), jnp.float32,
                              minval=-scale, maxval=scale)
    return weight, bias, block_mask


def _check(y, x, weight, bias, block_mask, params):
    # Tight reference: same quantized operands (bf16 x, bf16 masked W^T), f64
    # accumulate -> verifies kernel math / indexing / sparse skipping exactly.
    xq = np.asarray(x.astype(params["wt"].dtype).astype(jnp.float32), np.float64)
    wtq = np.asarray(params["wt"].astype(jnp.float32), np.float64)
    y_ref = xq @ wtq + np.asarray(bias, np.float64)
    np.testing.assert_allclose(np.asarray(y, np.float64), y_ref,
                               rtol=1e-3, atol=1e-3)
    # Loose reference: exact f32 module semantics (only deviation = bf16 storage).
    dm = np.repeat(np.repeat(np.asarray(block_mask, bool), BLOCK, 0), BLOCK, 1)
    y_exact = (np.asarray(x, np.float64)
               @ (np.asarray(weight, np.float64) * dm).T
               + np.asarray(bias, np.float64))
    np.testing.assert_allclose(np.asarray(y, np.float64), y_exact,
                               rtol=3e-2, atol=8e-2)


if __name__ == "__main__":
    key = jax.random.PRNGKey(0)
    kx1, kx2, kp1, kp2 = jax.random.split(key, 4)

    # --- Case A: module default density=0.5, auto (large) tiles -> dense path.
    batch, in_f, out_f = 16, 256, 256
    x = jax.random.normal(kx1, (batch, in_f), jnp.float32)
    weight, bias, block_mask = init_params(kp1, in_f, out_f, density=0.5)
    params = prepare_blocksparse_params(weight, bias, block_mask)
    assert not params["use_sparse"]
    y = jax.block_until_ready(blocksparse_linear(params, x))
    _check(y, x, weight, bias, block_mask, params)

    # --- Case B: same weights, forced 128 tiles -> dense path with a real
    #     multi-step reduction axis and multiple N-tile columns.
    params_b = prepare_blocksparse_params(weight, bias, block_mask, tk=128, tn=128)
    assert not params_b["use_sparse"]
    y = jax.block_until_ready(blocksparse_linear(params_b, x))
    _check(y, x, weight, bias, block_mask, params_b)

    # --- Case C: very sparse crafted mask -> sparse path; exercises DMA-level
    #     tile skipping plus the first / continue / empty-column branches.
    in_f2, out_f2 = 512, 512
    x2 = jax.random.normal(kx2, (batch, in_f2), jnp.float32)
    weight2, bias2, _ = init_params(kp2, in_f2, out_f2, density=0.5)
    bm2 = np.zeros((out_f2 // BLOCK, in_f2 // BLOCK), dtype=bool)
    bm2[2, 1] = True     # N-tile column 0, K-tile 0
    bm2[5, 10] = True    # N-tile column 0, K-tile 2
    # (N-tile column 1 left completely empty -> bias-only path)
    params_c = prepare_blocksparse_params(weight2, bias2, jnp.asarray(bm2))
    assert params_c["use_sparse"] and params_c["n_entries"] == 3
    y2 = jax.block_until_ready(blocksparse_linear(params_c, x2))
    _check(y2, x2, weight2, bias2, bm2, params_c)

    print("KERNEL_OK")
</pallas_src>

<mosaic_0001>
module attributes {stable_mosaic.version = 11 : i64} {
  func.func @_dense_kernel(%arg0: i32, %arg1: i32, %arg2: i32, %arg3: memref<16x256xbf16, #tpu.memory_space<vmem>>, %arg4: memref<256x256xbf16, #tpu.memory_space<vmem>>, %arg5: memref<1x256xf32, #tpu.memory_space<vmem>>, %arg6: memref<16x256xf32, #tpu.memory_space<vmem>>) attributes {dimension_semantics = [#tpu.dimension_semantics<parallel>, #tpu.dimension_semantics<parallel>, #tpu.dimension_semantics<arbitrary>], iteration_bounds = array<i64: 1, 1, 1>, scalar_prefetch = 0 : i64, scratch_operands = 0 : i64, tpu.core_type = #tpu.core_type<tc>, window_params = [{transform_indices = @transform_0, window_bounds = array<i64: 16, 256>}, {transform_indices = @transform_1, window_bounds = array<i64: 256, 256>}, {transform_indices = @transform_2, window_bounds = array<i64: 1, 256>}, {transform_indices = @transform_3, window_bounds = array<i64: 16, 256>}]} {
    %c0 = arith.constant 0 : index
    %c0_0 = arith.constant 0 : index
    %0 = vector.load %arg3[%c0, %c0_0] : memref<16x256xbf16, #tpu.memory_space<vmem>>, vector<16x256xbf16>
    %c0_1 = arith.constant 0 : index
    %c0_2 = arith.constant 0 : index
    %1 = vector.load %arg4[%c0_1, %c0_2] : memref<256x256xbf16, #tpu.memory_space<vmem>>, vector<256x256xbf16>
    %cst = arith.constant dense<0.000000e+00> : vector<16x256xf32>
    %2 = tpu.matmul %0, %1, %cst {dimension_numbers = #tpu.dot_dimension_numbers<[1], [0], [0], [1], [0, 0, 1, 1], [], []>} : vector<16x256xbf16>, vector<256x256xbf16>, vector<16x256xf32> -> vector<16x256xf32>
    %c0_i32 = arith.constant 0 : i32
    %3 = arith.cmpi eq, %arg2, %c0_i32 : i32
    %4 = arith.extui %3 : i1 to i32
    %c0_i32_3 = arith.constant 0 : i32
    %5 = arith.cmpi ne, %4, %c0_i32_3 : i32
    scf.if %5 {
      %c0_6 = arith.constant 0 : index
      %c0_7 = arith.constant 0 : index
      %9 = vector.load %arg5[%c0_6, %c0_7] : memref<1x256xf32, #tpu.memory_space<vmem>>, vector<1x256xf32>
      %10 = vector.broadcast %9 : vector<1x256xf32> to vector<16x256xf32>
      %11 = arith.addf %2, %10 : vector<16x256xf32>
      %c0_8 = arith.constant 0 : index
      %c0_9 = arith.constant 0 : index
      %12 = vector.load %arg6[%c0_8, %c0_9] : memref<16x256xf32, #tpu.memory_space<vmem>>, vector<16x256xf32>
      tpu.vector_store %arg6[%c0_8, %c0_9], %11 {strides = array<i32>} : memref<16x256xf32, #tpu.memory_space<vmem>>, vector<16x256xf32>,
    } else {
    }
    %c0_i32_4 = arith.constant 0 : i32
    %6 = arith.cmpi sgt, %arg2, %c0_i32_4 : i32
    %7 = arith.extui %6 : i1 to i32
    %c0_i32_5 = arith.constant 0 : i32
    %8 = arith.cmpi ne, %7, %c0_i32_5 : i32
    scf.if %8 {
      %c0_6 = arith.constant 0 : index
      %c0_7 = arith.constant 0 : index
      %9 = vector.load %arg6[%c0_6, %c0_7] : memref<16x256xf32, #tpu.memory_space<vmem>>, vector<16x256xf32>
      %10 = arith.addf %9, %2 : vector<16x256xf32>
      %c0_8 = arith.constant 0 : index
      %c0_9 = arith.constant 0 : index
      %11 = vector.load %arg6[%c0_8, %c0_9] : memref<16x256xf32, #tpu.memory_space<vmem>>, vector<16x256xf32>
      tpu.vector_store %arg6[%c0_8, %c0_9], %10 {strides = array<i32>} : memref<16x256xf32, #tpu.memory_space<vmem>>, vector<16x256xf32>,
    } else {
    }
    return
  }
  func.func @transform_0(%arg0: i32, %arg1: i32, %arg2: i32) -> (i32, i32) {
    %c0_i32 = arith.constant 0 : i32
    return %arg0, %arg2 : i32, i32
  }
  func.func @transform_1(%arg0: i32, %arg1: i32, %arg2: i32) -> (i32, i32) {
    %c0_i32 = arith.constant 0 : i32
    return %arg2, %arg1 : i32, i32
  }
  func.func @transform_2(%arg0: i32, %arg1: i32, %arg2: i32) -> (i32, i32) {
    %c0_i32 = arith.constant 0 : i32
    %c0_i32_0 = arith.constant 0 : i32
    return %c0_i32, %arg1 : i32, i32
  }
  func.func @transform_3(%arg0: i32, %arg1: i32, %arg2: i32) -> (i32, i32) {
    %c0_i32 = arith.constant 0 : i32
    return %arg0, %arg1 : i32, i32
  }
}

</mosaic_0001>

<bundles_post_ra>
// kernel: tpu_custom_call.1
= control target key start
LH: loop header
LB: loop body
LE: loop exit
PB: predicated region body
PF: predicated region fallthrough
CT: control target
= control target key end

     0   :  { %8 = vsyncpa [#allocation3], 0  ;;  %s545_s0 = inlined_call_operand.hbm [shape: bf16[16,256], index: 0, kind: input, shape index: {}]   ;;  %s546_s1 = inlined_call_operand.hbm [shape: bf16[256,256], index: 1, kind: input, shape index: {}]   ;;  %s547_s2 = inlined_call_operand.vmem [shape: f32[1,256], index: 2, kind: input, shape index: {}]   ;;  %s548_s3 = inlined_call_operand.hbm [shape: f32[16,256], index: 3, kind: output, shape index: {}]  }
   0x1   :  { %9 = vsyncpa [#allocation6], 0 }
   0x2   :  { %10 = vsyncpa [#allocation4], 0  ;;  %s506_s12 = smov [#allocation2]  }
   0x3   :  { %s16_s13 = sshll.u32 %s506_s12, 4  ;;  %s17_s13 = int_to_ptr.vmem [resolvable:$true] %s16_s13 }
   0x4   :  { %s448_s14 = scalar_lea.vmem %s17_s13, 256  ;;  %p453_p1 = scmp.lt.s32.totalorder %s17_s13, %s17_s13 }
   0x5   :  { %p449_p0 = scmp.ne.s32.totalorder %s17_s13, %s448_s14  ;;  %p454_p2 = scmp.lt.s32.totalorder %s448_s14, %s448_s14 }
   0x7   :  { %p455_p3 = por %p454_p2, %p453_p1 }
   0x9   :  { %p456_p4 = pnand %p455_p3, %p449_p0 }
   0xb   :  { %459 = shalt.err (!%p456_p4)
}
   0xc   :  { %s507_s15 = smov 128   ;;  %s508_s16 = smov 8  }
   0xd   :  { %22 = dma.hbm_to_vmem [thread:$0]  %s545_s0, 256, %s17_s13, [#allocation3], %s507_s15, %s507_s15, %s508_s16  }
   0xe   :  { %s509_s19 = smov [#allocation5]  }
   0xf   :  { %s28_s20 = sshll.u32 %s509_s19, 4  ;;  %s29_s20 = int_to_ptr.vmem [resolvable:$true] %s28_s20 }
  0x10   :  { %s468_s21 = scalar_lea.vmem %s29_s20, 4096  ;;  %p473_p6 = scmp.lt.s32.totalorder %s29_s20, %s29_s20 }
  0x11   :  { %p469_p5 = scmp.ne.s32.totalorder %s29_s20, %s468_s21  ;;  %p474_p7 = scmp.lt.s32.totalorder %s468_s21, %s468_s21 }
  0x13   :  { %p475_p8 = por %p474_p7, %p473_p6 }
  0x15   :  { %p476_p9 = pnand %p475_p8, %p469_p5 }
  0x17   :  { %479 = shalt.err (!%p476_p9)
}
  0x18   :  { %34 = dma.hbm_to_vmem [thread:$0]  %s546_s1, 4096, %s29_s20, [#allocation6], %s507_s15, %s507_s15, %s508_s16  }
  0x19   :  { %500 = dma.done.wait [#allocation3], 256  }
  0x1a   :  { %501 = vsyncadd [#allocation3], 4294967040 }
  0x1b   :  { %502 = dma.done.wait [#allocation6], 4096  }
  0x1c   :  { %503 = vsyncadd [#allocation6], 4294963200  ;;  %v389_v0 = vld [vmem:[#allocation5 + $0x74] ss:$8 sps:$4 sm:$0xff]   ;;  %v391_v1 = vld [vmem:[#allocation5 + $0x70] ss:$8 sps:$4 sm:$0xff]   ;;  %v296_v34 = vlaneseq }
  0x1d   :  { %247 = vmatprep.subr.bf16.mxu0 %v389_v0  ;;  %v392_v2 = vld [vmem:[#allocation5 + $0x64] ss:$8 sps:$4 sm:$0xff]   ;;  %v394_v3 = vld [vmem:[#allocation5 + $0x60] ss:$8 sps:$4 sm:$0xff]   ;;  %v395_v4 = vld [vmem:[#allocation5 + $0x54] ss:$8 sps:$4 sm:$0xff]  }
  0x1e   :  { %248 = vmatpush1.bf16.msra.mxu0 %v391_v1  ;;  %v397_v5 = vld [vmem:[#allocation5 + $0x50] ss:$8 sps:$4 sm:$0xff]   ;;  %v398_v6 = vld [vmem:[#allocation5 + $0x44] ss:$8 sps:$4 sm:$0xff]   ;;  %v400_v7 = vld [vmem:[#allocation5 + $0x40] ss:$8 sps:$4 sm:$0xff]  }
  0x1f   :  { %249 = vmatprep.subr.bf16.mxu0 %v392_v2  ;;  %v401_v8 = vld [vmem:[#allocation5 + $0x34] ss:$8 sps:$4 sm:$0xff]   ;;  %v403_v9 = vld [vmem:[#allocation5 + $0x30] ss:$8 sps:$4 sm:$0xff]   ;;  %v404_v10 = vld [vmem:[#allocation5 + $0x24] ss:$8 sps:$4 sm:$0xff]  }
  0x20   :  { %v406_v11 = vld [vmem:[#allocation5 + $0x20] ss:$8 sps:$4 sm:$0xff]   ;;  %v407_v12 = vld [vmem:[#allocation5 + $0x14] ss:$8 sps:$4 sm:$0xff]   ;;  %v409_v14 = vld [vmem:[#allocation5 + $0x10] ss:$8 sps:$4 sm:$0xff]  }
  0x21   :  { %v439_v13 = vld [vmem:[#allocation2 + $0x4] ss:$8 sps:$4 sm:$0xff]   ;;  %v410_v15 = vld [vmem:[#allocation5 + $0x4] ss:$8 sps:$4 sm:$0xff]   ;;  %v412_v16 = vld [vmem:[#allocation5] ss:$8 sps:$4 sm:$0xff]  }
  0x22   :  { %250 = vmatpush1.bf16.msra.mxu0 %v394_v3  ;;  %279 = vmatprep.mubr.bf16.mxu0 %v439_v13  ;;  %v413_v17 = vld [vmem:[#allocation5 + $0xf4] ss:$8 sps:$4 sm:$0xff]   ;;  %v415_v18 = vld [vmem:[#allocation5 + $0xf0] ss:$8 sps:$4 sm:$0xff]   ;;  %v416_v19 = vld [vmem:[#allocation5 + $0xe4] ss:$8 sps:$4 sm:$0xff]  }
  0x23   :  { %251 = vmatprep.subr.bf16.mxu0 %v395_v4  ;;  %v418_v20 = vld [vmem:[#allocation5 + $0xe0] ss:$8 sps:$4 sm:$0xff]   ;;  %v419_v21 = vld [vmem:[#allocation5 + $0xd4] ss:$8 sps:$4 sm:$0xff]   ;;  %v421_v22 = vld [vmem:[#allocation5 + $0xd0] ss:$8 sps:$4 sm:$0xff]  }
  0x24   :  { %v422_v23 = vld [vmem:[#allocation5 + $0xc4] ss:$8 sps:$4 sm:$0xff]   ;;  %v424_v24 = vld [vmem:[#allocation5 + $0xc0] ss:$8 sps:$4 sm:$0xff]   ;;  %v425_v25 = vld [vmem:[#allocation5 + $0xb4] ss:$8 sps:$4 sm:$0xff]  }
  0x25   :  { %v427_v26 = vld [vmem:[#allocation5 + $0xb0] ss:$8 sps:$4 sm:$0xff]   ;;  %v428_v27 = vld [vmem:[#allocation5 + $0xa4] ss:$8 sps:$4 sm:$0xff]   ;;  %v430_v28 = vld [vmem:[#allocation5 + $0xa0] ss:$8 sps:$4 sm:$0xff]  }
  0x26   :  { %252 = vmatpush1.bf16.msra.mxu0 %v397_v5  ;;  %v431_v29 = vld [vmem:[#allocation5 + $0x94] ss:$8 sps:$4 sm:$0xff]   ;;  %v433_v30 = vld [vmem:[#allocation5 + $0x90] ss:$8 sps:$4 sm:$0xff]   ;;  %v434_v31 = vld [vmem:[#allocation5 + $0x84] ss:$8 sps:$4 sm:$0xff]  }
  0x27   :  { %253 = vmatprep.subr.bf16.mxu0 %v398_v6  ;;  %v436_v32 = vld [vmem:[#allocation5 + $0x80] ss:$8 sps:$4 sm:$0xff]   ;;  %v437_v33 = vld [vmem:[#allocation2] ss:$8 sps:$4 sm:$0xff]   ;;  %v297_v35 = vshrl.u32 %v296_v34, 7  ;;  %s510_s24 = smov [#allocation7]  }
  0x28   :  { %v294_v37 = vld [vmem:[%s547_s2] sm:$0x3]  ;;  %s335_s25 = sshll.u32 %s510_s24, 4  ;;  %s336_s25 = int_to_ptr.vmem [resolvable:$true] %s335_s25 }
  0x29   :  { %v298_v36 = vsub.s32 0, %v297_v35  ;;  %v302_v38 = vsub.s32 1, %v297_v35  ;;  %s480_s26 = scalar_lea.vmem %s336_s25, 512  ;;  %p485_p11 = scmp.lt.s32.totalorder %s336_s25, %s336_s25 }
  0x2a   :  { %254 = vmatpush1.bf16.msra.mxu0 %v400_v7  ;;  %p481_p10 = scmp.ne.s32.totalorder %s336_s25, %s480_s26  ;;  %p486_p12 = scmp.lt.s32.totalorder %s480_s26, %s480_s26 }
  0x2b   :  { %255 = vmatprep.subr.bf16.mxu0 %v401_v8  ;;  %v299_v39 = vrot.slane %v294_v37, %v298_v36  ;;  %v303_v40 = vrot.slane %v294_v37, %v302_v38 }
  0x2c   :  { %p487_p13 = por %p486_p12, %p485_p11 }
  0x2e   :  { %256 = vmatpush1.bf16.msra.mxu0 %v403_v9  ;;  %p488_p0 = pnand %p487_p13, %p481_p10 }
  0x2f   :  { %257 = vmatprep.subr.bf16.mxu0 %v404_v10 }
  0x32   :  { %258 = vmatpush1.bf16.msra.mxu0 %v406_v11 }
  0x33   :  { %259 = vmatprep.subr.bf16.mxu0 %v407_v12 }
  0x36   :  { %260 = vmatpush1.bf16.msra.mxu0 %v409_v14 }
  0x37   :  { %261 = vmatprep.subr.bf16.mxu0 %v410_v15 }
  0x3a   :  { %262 = vmatpush1.bf16.msra.mxu0 %v412_v16 }
  0x3b   :  { %263 = vmatprep.subr.bf16.mxu0 %v413_v17 }
  0x3e   :  { %264 = vmatpush2.bf16.msra.mxu0 %v415_v18 }
  0x3f   :  { %265 = vmatprep.subr.bf16.mxu0 %v416_v19 }
  0x42   :  { %266 = vmatpush2.bf16.msra.mxu0 %v418_v20 }
  0x43   :  { %267 = vmatprep.subr.bf16.mxu0 %v419_v21 }
  0x46   :  { %268 = vmatpush2.bf16.msra.mxu0 %v421_v22 }
  0x47   :  { %269 = vmatprep.subr.bf16.mxu0 %v422_v23 }
  0x4a   :  { %270 = vmatpush2.bf16.msra.mxu0 %v424_v24 }
  0x4b   :  { %271 = vmatprep.subr.bf16.mxu0 %v425_v25 }
  0x4e   :  { %272 = vmatpush2.bf16.msra.mxu0 %v427_v26 }
  0x4f   :  { %273 = vmatprep.subr.bf16.mxu0 %v428_v27 }
  0x52   :  { %274 = vmatpush2.bf16.msra.mxu0 %v430_v28 }
  0x53   :  { %275 = vmatprep.subr.bf16.mxu0 %v431_v29 }
  0x56   :  { %276 = vmatpush2.bf16.msra.mxu0 %v433_v30 }
  0x57   :  { %277 = vmatprep.subr.bf16.mxu0 %v434_v31 }
  0x5a   :  { %278 = vmatpush2.bf16.msra.mxu0 %v436_v32 }
  0x5d   :  { %280 = vmatmul.mubr.bf16.vlgmr.msra.gmra.mxu0 %v437_v33 }
 0x11d   :  { %v281_v41 = vpop.f32.mrf.mxu0 }
 0x11e   :  { %v306_v42 = vadd.f32 %v299_v39, %v281_v41 }
 0x11f   :  { %v283_v43 = vpop.f32.mrf.mxu0 }
 0x120   :  { %310 = vst [vmem:[#allocation7] sm:$0xff] %v306_v42  ;;  %v307_v44 = vadd.f32 %v303_v40, %v283_v43 }
 0x121   :  { %v285_v45 = vpop.f32.mrf.mxu0 }
 0x122   :  { %311 = vst [vmem:[#allocation7 + $0x8] sm:$0xff] %v307_v44  ;;  %v308_v46 = vadd.f32 %v299_v39, %v285_v45 }
 0x123   :  { %v287_v47 = vpop.f32.mrf.mxu0 }
 0x124   :  { %312 = vst [vmem:[#allocation7 + $0x10] sm:$0xff] %v308_v46  ;;  %v309_v48 = vadd.f32 %v303_v40, %v287_v47 }
 0x126   :  { %313 = vst [vmem:[#allocation7 + $0x18] sm:$0xff] %v309_v48 }
 0x127   :  { %491 = shalt.err (!%p488_p0)
}
 0x128   :  { %s511_s2 = smov 256   ;;  %s512_s27 = smov 16  }
 0x129   :  { %341 = dma.vmem_to_hbm [thread:$0]  %s336_s25, 512, %s548_s3, [#allocation4], %s511_s2, %s511_s2, %s512_s27  }
 0x12a   :  { %504 = dma.done.wait [#allocation4], 512  }
 0x12b   :  { %505 = vsyncadd [#allocation4], 4294966784 }
 0x12c   :  { %345 = vsyncpa [#allocation3], 1 }
 0x12d   :  { %346 = vsyncpa [#allocation6], 1 }
 0x12e   :  { %347 = vsyncpa [#allocation4], 1 }

</bundles_post_ra>
